<compile_context>
chip_gen: v6e
topology: v6e:2x2x1
jax: 0.10.0
libtpu: 0.0.40
codegen_flags: <defaults>
</compile_context>

<pallas_src>
import jax
import jax.numpy as jnp
from jax.experimental import pallas as pl
from jax.experimental.pallas import tpu as pltpu
from functools import partial


def _rmsnorm_kernel(x_ref, w_ref, o_ref, *, eps):
    # x_ref: (TILE_ROWS, HIDDEN), w_ref: (1, HIDDEN), o_ref: (TILE_ROWS, HIDDEN)
    x_f32 = x_ref[...].astype(jnp.float32)
    # variance = mean(x^2) over the last axis, in float32 (matches torch)
    variance = jnp.mean(x_f32 * x_f32, axis=-1, keepdims=True)
    y = x_f32 * jax.lax.rsqrt(variance + eps)           # f32, like torch
    w = w_ref[...]
    # torch casts hidden_states back to the weight dtype BEFORE multiplying
    # when the weight is half precision.
    if w.dtype == jnp.float16 or w.dtype == jnp.bfloat16:
        y = y.astype(w.dtype)
    o_ref[...] = (w * y).astype(o_ref.dtype)


def _result_dtype(x_dtype, w_dtype):
    """Output dtype following the PyTorch module's promotion rules."""
    del x_dtype  # hidden_states is f32 after the rsqrt multiply regardless
    w_dtype = jnp.dtype(w_dtype)
    if w_dtype == jnp.float16 or w_dtype == jnp.bfloat16:
        h_dtype = w_dtype
    else:
        h_dtype = jnp.dtype(jnp.float32)
    return jnp.promote_types(w_dtype, h_dtype)


def rmsnorm(x, weight, eps=1e-6, tile_rows=None, target_tile_bytes=4 << 20):
    """x: (..., hidden), weight: (hidden,) -> RMSNorm over the last axis."""
    orig_shape = x.shape
    hidden = orig_shape[-1]
    x2d = x.reshape(-1, hidden)
    rows = x2d.shape[0]
    w2d = weight.reshape(1, hidden)

    out_dtype = _result_dtype(x.dtype, weight.dtype)
    x_itemsize = jnp.dtype(x.dtype).itemsize
    o_itemsize = jnp.dtype(out_dtype).itemsize
    w_itemsize = jnp.dtype(weight.dtype).itemsize

    # Sublane alignment of the narrowest array touching HBM (8 for 4B, 16 for 2B).
    row_align = max(8, 32 // min(x_itemsize, o_itemsize))

    if tile_rows is None:
        # Aim for ~target_tile_bytes per input block (mem-bound: big DMAs win),
        # but never more than 1024 rows (keeps double-buffered VMEM well under
        # v7x's 64 MiB budget even for large hidden).
        tile_rows = max(row_align, target_tile_bytes // (hidden * x_itemsize))
        tile_rows = (tile_rows // row_align) * row_align
        tile_rows = min(tile_rows, 1024)
    # Never exceed the (alignment-rounded) number of rows.
    rows_ceil = ((rows + row_align - 1) // row_align) * row_align
    tile_rows = max(row_align, min(tile_rows, rows_ceil))

    num_blocks = pl.cdiv(rows, tile_rows)
    rows_padded = num_blocks * tile_rows
    if rows_padded != rows:
        # Zero rows normalize to zero (rsqrt(eps) is finite) and are sliced off.
        x2d = jnp.pad(x2d, ((0, rows_padded - rows), (0, 0)))

    # VMEM budget: double-buffered input + output tiles, weight, plus slack.
    tile_in_bytes = tile_rows * hidden * x_itemsize
    tile_out_bytes = tile_rows * hidden * o_itemsize
    vmem_needed = 2 * (tile_in_bytes + tile_out_bytes) + 2 * hidden * w_itemsize + (1 << 20)
    vmem_limit = int(max(vmem_needed, 32 << 20))

    out = pl.pallas_call(
        partial(_rmsnorm_kernel, eps=float(eps)),
        out_shape=jax.ShapeDtypeStruct((rows_padded, hidden), out_dtype),
        grid_spec=pltpu.PrefetchScalarGridSpec(
            num_scalar_prefetch=0,
            grid=(num_blocks,),
            in_specs=[
                pl.BlockSpec((tile_rows, hidden), lambda i: (i, 0)),
                # weight: constant index map -> resident across grid steps.
                pl.BlockSpec((1, hidden), lambda i: (0, 0)),
            ],
            out_specs=pl.BlockSpec((tile_rows, hidden), lambda i: (i, 0)),
        ),
        compiler_params=pltpu.CompilerParams(
            dimension_semantics=("parallel",),
            vmem_limit_bytes=vmem_limit,
        ),
    )(x2d, w2d)

    if rows_padded != rows:
        out = out[:rows]
    return out.reshape(orig_shape)


def rmsnorm_ref(x, weight, eps=1e-6):
    """Pure-JAX reference mirroring the PyTorch module exactly."""
    x_f32 = x.astype(jnp.float32)
    variance = jnp.mean(x_f32 * x_f32, axis=-1, keepdims=True)
    h = x_f32 * jax.lax.rsqrt(variance + eps)
    if weight.dtype == jnp.float16 or weight.dtype == jnp.bfloat16:
        h = h.astype(weight.dtype)
    return weight * h


if __name__ == "__main__":
    key = jax.random.PRNGKey(0)
    k1, k2, k3 = jax.random.split(key, 3)

    # Case 1: float32 activations, weight initialized to ones (LlamaRMSNorm init).
    batch, seq, hidden = 2, 8, 128
    x = jax.random.normal(k1, (batch, seq, hidden), dtype=jnp.float32)
    weight = jnp.ones((hidden,), dtype=jnp.float32)
    out = jax.block_until_ready(rmsnorm(x, weight, eps=1e-6))
    ref = rmsnorm_ref(x, weight, eps=1e-6)
    assert out.shape == ref.shape and out.dtype == ref.dtype
    assert jnp.allclose(out, ref, atol=1e-5, rtol=1e-5), "f32 mismatch vs reference"

    # Case 2: bf16 activations + bf16 weight, ragged row count (exercises row
    # padding and the cast-before-weight-multiply semantics).
    x_bf = jax.random.normal(k2, (3, 5, 256), dtype=jnp.bfloat16)
    w_bf = (1.0 + 0.1 * jax.random.normal(k3, (256,), dtype=jnp.float32)).astype(jnp.bfloat16)
    out_bf = jax.block_until_ready(rmsnorm(x_bf, w_bf, eps=1e-6))
    ref_bf = rmsnorm_ref(x_bf, w_bf, eps=1e-6)
    assert out_bf.shape == ref_bf.shape and out_bf.dtype == jnp.bfloat16
    assert jnp.allclose(out_bf.astype(jnp.float32), ref_bf.astype(jnp.float32),
                        atol=2e-2, rtol=2e-2), "bf16 mismatch vs reference"

    print("KERNEL_OK")
</pallas_src>

<mosaic_0001>
module attributes {stable_mosaic.version = 11 : i64} {
  func.func @_rmsnorm_kernel(%arg0: i32, %arg1: memref<16x128xf32, #tpu.memory_space<vmem>>, %arg2: memref<1x128xf32, #tpu.memory_space<vmem>>, %arg3: memref<16x128xf32, #tpu.memory_space<vmem>>) attributes {dimension_semantics = [#tpu.dimension_semantics<parallel>], iteration_bounds = array<i64: 1>, scalar_prefetch = 0 : i64, scratch_operands = 0 : i64, tpu.core_type = #tpu.core_type<tc>, window_params = [{transform_indices = @transform_0, window_bounds = array<i64: 16, 128>}, {pipeline_mode = #tpu.pipeline_mode<synchronous>, transform_indices = @transform_1, window_bounds = array<i64: 1, 128>}, {transform_indices = @transform_2, window_bounds = array<i64: 16, 128>}]} {
    %c0 = arith.constant 0 : index
    %c0_0 = arith.constant 0 : index
    %0 = vector.load %arg1[%c0, %c0_0] : memref<16x128xf32, #tpu.memory_space<vmem>>, vector<16x128xf32>
    %1 = arith.mulf %0, %0 : vector<16x128xf32>
    %cst = arith.constant dense<0.000000e+00> : vector<16xf32>
    %2 = vector.multi_reduction <add>, %1, %cst [1] : vector<16x128xf32> to vector<16xf32>
    %3 = vector.shape_cast %2 : vector<16xf32> to vector<16x1xf32>
    %cst_1 = arith.constant 1.280000e+02 : f32
    %4 = vector.broadcast %cst_1 : f32 to vector<16x1xf32>
    %5 = arith.divf %3, %4 : vector<16x1xf32>
    %cst_2 = arith.constant 9.99999997E-7 : f32
    %6 = vector.broadcast %cst_2 : f32 to vector<16x1xf32>
    %7 = arith.addf %5, %6 : vector<16x1xf32>
    %8 = math.rsqrt %7 : vector<16x1xf32>
    %9 = vector.broadcast %8 : vector<16x1xf32> to vector<16x128xf32>
    %10 = arith.mulf %0, %9 : vector<16x128xf32>
    %c0_3 = arith.constant 0 : index
    %c0_4 = arith.constant 0 : index
    %11 = vector.load %arg2[%c0_3, %c0_4] : memref<1x128xf32, #tpu.memory_space<vmem>>, vector<1x128xf32>
    %12 = vector.broadcast %11 : vector<1x128xf32> to vector<16x128xf32>
    %13 = arith.mulf %12, %10 : vector<16x128xf32>
    %c0_5 = arith.constant 0 : index
    %c0_6 = arith.constant 0 : index
    %14 = vector.load %arg3[%c0_5, %c0_6] : memref<16x128xf32, #tpu.memory_space<vmem>>, vector<16x128xf32>
    tpu.vector_store %arg3[%c0_5, %c0_6], %13 {strides = array<i32>} : memref<16x128xf32, #tpu.memory_space<vmem>>, vector<16x128xf32>,
    return
  }
  func.func @transform_0(%arg0: i32) -> (i32, i32) {
    %c0_i32 = arith.constant 0 : i32
    %c0_i32_0 = arith.constant 0 : i32
    return %arg0, %c0_i32 : i32, i32
  }
  func.func @transform_1(%arg0: i32) -> (i32, i32) {
    %c0_i32 = arith.constant 0 : i32
    %c0_i32_0 = arith.constant 0 : i32
    %c0_i32_1 = arith.constant 0 : i32
    return %c0_i32, %c0_i32_0 : i32, i32
  }
  func.func @transform_2(%arg0: i32) -> (i32, i32) {
    %c0_i32 = arith.constant 0 : i32
    %c0_i32_0 = arith.constant 0 : i32
    return %arg0, %c0_i32 : i32, i32
  }
}

</mosaic_0001>

<bundles_post_ra>
// kernel: tpu_custom_call.1
= control target key start
LH: loop header
LB: loop body
LE: loop exit
PB: predicated region body
PF: predicated region fallthrough
CT: control target
= control target key end

     0   :  { %7 = vsyncpa [#allocation3], 0  ;;  %s158_s0 = inlined_call_operand.hbm [shape: f32[16,128], index: 0, kind: input, shape index: {}]   ;;  %s159_s1 = inlined_call_operand.vmem [shape: f32[1,128], index: 1, kind: input, shape index: {}]   ;;  %s160_s2 = inlined_call_operand.hbm [shape: f32[16,128], index: 2, kind: output, shape index: {}]  }
   0x1   :  { %8 = vsyncpa [#allocation4], 0  ;;  %s124_s9 = smov [#allocation2]  }
   0x2   :  { %s14_s10 = sshll.u32 %s124_s9, 4  ;;  %s15_s10 = int_to_ptr.vmem [resolvable:$true] %s14_s10 }
   0x3   :  { %s88_s11 = scalar_lea.vmem %s15_s10, 256  ;;  %p93_p1 = scmp.lt.s32.totalorder %s15_s10, %s15_s10 }
   0x4   :  { %p89_p0 = scmp.ne.s32.totalorder %s15_s10, %s88_s11  ;;  %p94_p2 = scmp.lt.s32.totalorder %s88_s11, %s88_s11 }
   0x6   :  { %p95_p3 = por %p94_p2, %p93_p1 }
   0x8   :  { %p96_p4 = pnand %p95_p3, %p89_p0 }
   0xa   :  { %99 = shalt.err (!%p96_p4)
}
   0xb   :  { %s125_s12 = smov 128   ;;  %s126_s13 = smov 8  }
   0xc   :  { %20 = dma.hbm_to_vmem [thread:$0]  %s158_s0, 256, %s15_s10, [#allocation3], %s125_s12, %s125_s12, %s126_s13  }
   0xd   :  { %120 = dma.done.wait [#allocation3], 256  }
   0xe   :  { %121 = vsyncadd [#allocation3], 4294967040  ;;  %v26_v0 = vld [vmem:[#allocation2] sm:$0xff]  ;;  %v27_v1 = vld [vmem:[#allocation2 + $0x8] sm:$0xff]  ;;  %s127_s0 = smov [#allocation5]  }
   0xf   :  { %v28_v2 = vmul.f32 %v26_v0, %v26_v0  ;;  %v29_v3 = vmul.f32 %v27_v1, %v27_v1  ;;  %v71_v11 = vld [vmem:[%s159_s1] ss:$0 sm:$0xff]  ;;  %s59_s18 = sshll.u32 %s127_s0, 4  ;;  %s60_s18 = int_to_ptr.vmem [resolvable:$true] %s59_s18 }
  0x10   :  { %s100_s19 = scalar_lea.vmem %s60_s18, 256  ;;  %p105_p6 = scmp.lt.s32.totalorder %s60_s18, %s60_s18 }
  0x11   :  { %30 = vadd.xlane.f32.xlu0 %v28_v2  ;;  %p101_p5 = scmp.ne.s32.totalorder %s60_s18, %s100_s19  ;;  %p106_p7 = scmp.lt.s32.totalorder %s100_s19, %s100_s19 }
  0x13   :  { %p107_p8 = por %p106_p7, %p105_p6 }
  0x15   :  { %32 = vadd.xlane.f32.xlu0 %v29_v3  ;;  %p108_p9 = pnand %p107_p8, %p101_p5 }
  0x9a   :  { %v31_v4 = vpop.xlane.xlu0 %30 }
  0x9b   :  { %v35_v5 = vmul.f32 0.0078125, %v31_v4 }
  0x9d   :  { %v37_v6 = vadd.f32 1e-06, %v35_v5 }
  0x9e   :  { %v33_v7 = vpop.xlane.xlu0 %32 }
  0x9f   :  { %76 = vrsqrt.f32 %v37_v6  ;;  %v36_v8 = vmul.f32 0.0078125, %v33_v7 }
  0xa1   :  { %v38_v9 = vadd.f32 1e-06, %v36_v8 }
  0xa3   :  { %78 = vrsqrt.f32 %v38_v9 }
  0xac   :  { %v77_v10 = vpop.eup %76 }
  0xad   :  { %v41_v12 = vmul.f32 %v77_v10, %v26_v0 }
  0xaf   :  { %v50_v13 = vmul.f32 %v71_v11, %v41_v12 }
  0xb0   :  { %v79_v14 = vpop.eup %78 }
  0xb1   :  { %v42_v15 = vmul.f32 %v79_v14, %v27_v1  ;;  %52 = vst [vmem:[#allocation5] sm:$0xff] %v50_v13 }
  0xb3   :  { %v51_v16 = vmul.f32 %v71_v11, %v42_v15 }
  0xb5   :  { %53 = vst [vmem:[#allocation5 + $0x8] sm:$0xff] %v51_v16 }
  0xb6   :  { %111 = shalt.err (!%p108_p9)
}
  0xb7   :  { %65 = dma.vmem_to_hbm [thread:$0]  %s60_s18, 256, %s160_s2, [#allocation4], %s125_s12, %s125_s12, %s126_s13  }
  0xb8   :  { %122 = dma.done.wait [#allocation4], 256  }
  0xb9   :  { %123 = vsyncadd [#allocation4], 4294967040 }
  0xba   :  { %69 = vsyncpa [#allocation3], 1 }
  0xbb   :  { %70 = vsyncpa [#allocation4], 1 }

</bundles_post_ra>
